<compile_context>
chip_gen: v6e
topology: v6e:2x2x1
jax: 0.10.0
libtpu: 0.0.40
codegen_flags: <defaults>
</compile_context>

<pallas_src>
import jax
import jax.numpy as jnp
from jax.experimental import pallas as pl
from jax.experimental.pallas import tpu as pltpu


def _round_up(x, m):
    return -(-x // m) * m


def _round_down(x, m):
    return (x // m) * m


def _sublane_pack(itemsize):
    # sublane packing granularity: f32 -> 8 rows/vreg, bf16 -> 16, int8 -> 32
    return max(8, 32 // itemsize)


def _vmem_budget():
    """(per_buffer_bytes, vmem_limit_bytes) sized to the current TPU generation."""
    try:
        cap = int(pltpu.get_tpu_info().vmem_capacity_bytes)
    except Exception:
        cap = 64 << 20  # conservative fallback: v7x has the smallest VMEM (64 MiB)
    vmem_limit = min(cap * 3 // 4, 64 << 20)   # headroom vs. physical VMEM
    per_buffer = min(4 << 20, vmem_limit // 8)  # in+out double-buffered + slack
    return per_buffer, vmem_limit


def _dense_lane(N, T):
    # largest lane width (>= 2 KiB/row bursts for f32) dividing both N and T
    for L in (1024, 512, 256, 128):
        if N % L == 0 and T % L == 0:
            return L
    return None


# ----------------------------------------------------------------------------
# Sublane-dense fast path: few channels, 128-aligned N and T.
# Each channel's frame axis is viewed as a (rows, L) slab; crop/pad become a
# row-prefix copy / row-zero-pad, so every tile is sublane- and lane-dense.
# ----------------------------------------------------------------------------
def _dense_call(x, N, L, per_buffer, params):
    C, T = x.shape
    dtype = x.dtype
    itemsize = jnp.dtype(dtype).itemsize
    NR, TRT = N // L, T // L            # output / input rows per channel
    xr = x.reshape(C, TRT, L)           # free view: frames -> (rows, L)

    tr = max(8, _round_down(per_buffer // (L * itemsize), 8))
    tr = min(tr, _round_up(NR, 8))
    if C == 1 and NR >= 16 and pl.cdiv(NR, tr) < 2:
        # keep >= 2 grid blocks so both v7x TensorCores get work
        tr = min(tr, _round_up(_round_up(NR, 2) // 2, 8))
    grid = (C, pl.cdiv(NR, tr))

    if N <= T:
        # crop: identity copy.  The last input block may read stale rows past
        # NR (and, for a partial input block, past TRT); the matching output
        # block is partial, so Pallas never stores those rows.
        def kernel(x_ref, o_ref):
            o_ref[...] = x_ref[...]

        in_map = lambda c, r: (c, r, 0)
        bytes_accessed = 2 * C * N * itemsize
    else:
        # pad: blocks fully inside T copy, the single straddle block masks by
        # row, tail blocks write zeros and never touch x (clamped index map ->
        # the input DMA re-targets the same block and is skipped).
        n_in_blocks = pl.cdiv(TRT, tr)
        jb, rem = TRT // tr, TRT % tr
        in_map = lambda c, r: (c, jnp.minimum(r, n_in_blocks - 1), 0)

        def kernel(x_ref, o_ref):
            r = pl.program_id(1)

            @pl.when(r < jb)
            def _():
                o_ref[...] = x_ref[...]

            if rem:
                @pl.when(r == jb)
                def _():
                    row = jb * tr + jax.lax.broadcasted_iota(
                        jnp.int32, o_ref.shape, 0)
                    xv = x_ref[...]
                    o_ref[...] = jnp.where(row < TRT, xv, jnp.zeros_like(xv))

            @pl.when(r >= jb + (1 if rem else 0))
            def _():
                o_ref[...] = jnp.zeros(o_ref.shape, o_ref.dtype)

        bytes_accessed = (C * T + C * N) * itemsize

    out = pl.pallas_call(
        kernel,
        out_shape=jax.ShapeDtypeStruct((C, NR, L), dtype),
        grid=grid,
        in_specs=[pl.BlockSpec((None, tr, L), in_map)],
        out_specs=pl.BlockSpec((None, tr, L), lambda c, r: (c, r, 0)),
        compiler_params=params,
        cost_estimate=pl.CostEstimate(
            flops=0, transcendentals=0, bytes_accessed=bytes_accessed),
    )(xr)
    return out.reshape(C, N)


# ----------------------------------------------------------------------------
# Generic 2-D path: (C, T) tiled as (row blocks, column blocks).
# ----------------------------------------------------------------------------
def _generic_call(x, N, per_buffer, params):
    C, T = x.shape
    dtype = x.dtype
    itemsize = jnp.dtype(dtype).itemsize
    pack = _sublane_pack(itemsize)

    TC = C if C <= pack else min(1024, _round_down(C, pack))
    TC_pad = _round_up(TC, pack)        # VMEM sublane footprint of a (TC, *) tile

    if N < 128:
        TN = N
    else:
        tn_budget = max(128, _round_down(per_buffer // (TC_pad * itemsize), 128))
        TN = min(tn_budget, _round_down(N, 128))
        if N >= 256 and pl.cdiv(N, TN) < 2:
            # keep >= 2 column blocks so megacore (v7x) can shard the lane axis
            TN = min(TN, _round_up(_round_up(N, 2) // 2, 128))

    grid = (pl.cdiv(C, TC), pl.cdiv(N, TN))

    if N <= T:
        # crop: DMA only the needed prefix columns.  The last partial input
        # block may deliberately carry stale lanes past T / past N; the
        # matching output block is partial, so Pallas masks those stores.
        if TN % 128 == 0:
            TI = TN
            in_col_map = lambda i, j: (i, j)
        else:
            # N < 128 -> single output column block; fetch a minimal prefix.
            TI = T if T < 128 else 128
            in_col_map = lambda i, j: (i, 0)

        def kernel(x_ref, o_ref):
            o_ref[...] = x_ref[:, : o_ref.shape[1]]

        bytes_accessed = 2 * C * N * itemsize
    else:
        if T >= 128:
            # pad: copy / mask-straddle / zero, chosen statically per block.
            TI = TN
            n_in = pl.cdiv(T, TI)
            jb, rem = T // TN, T % TN
            in_col_map = lambda i, j: (i, jnp.minimum(j, n_in - 1))

            def kernel(x_ref, o_ref):
                j = pl.program_id(1)

                @pl.when(j < jb)
                def _():
                    o_ref[...] = x_ref[...]

                if rem:
                    @pl.when(j == jb)
                    def _():
                        col = jb * TN + jax.lax.broadcasted_iota(
                            jnp.int32, o_ref.shape, 1)
                        xv = x_ref[...]
                        o_ref[...] = jnp.where(col < T, xv, jnp.zeros_like(xv))

                @pl.when(j >= jb + (1 if rem else 0))
                def _():
                    o_ref[...] = jnp.zeros(o_ref.shape, o_ref.dtype)
        else:
            # tiny input (T < 128): one full-width input block; zero-store the
            # tile and overwrite the prefix on the first column block.
            TI = T
            in_col_map = lambda i, j: (i, 0)

            def kernel(x_ref, o_ref):
                o_ref[...] = jnp.zeros(o_ref.shape, o_ref.dtype)

                @pl.when(pl.program_id(1) == 0)
                def _():
                    o_ref[:, :T] = x_ref[...]

        bytes_accessed = (C * T + C * N) * itemsize

    return pl.pallas_call(
        kernel,
        out_shape=jax.ShapeDtypeStruct((C, N), dtype),
        grid=grid,
        in_specs=[pl.BlockSpec((TC, TI), in_col_map)],
        out_specs=pl.BlockSpec((TC, TN), lambda i, j: (i, j)),
        compiler_params=params,
        cost_estimate=pl.CostEstimate(
            flops=0, transcendentals=0, bytes_accessed=bytes_accessed),
    )(x)


def subsample_audio_frames(x, num_frames):
    """Pallas TPU implementation of SubSampleAudioFrames.forward.

    x: (C, T) array.  Returns (C, N): x[:, :N] if N <= T, else x zero-padded
    along the frame axis up to N.  num_frames must be a static Python int.
    """
    C, T = x.shape
    N = int(num_frames)  # TODO(synk): dynamic num_frames would need pl.ds/BoundedSlice
    itemsize = jnp.dtype(x.dtype).itemsize
    per_buffer, vmem_limit = _vmem_budget()
    params = pltpu.CompilerParams(
        dimension_semantics=("parallel", "parallel"),
        vmem_limit_bytes=vmem_limit)

    if C < _sublane_pack(itemsize):
        L = _dense_lane(N, T)
        if L is not None:
            return _dense_call(x, N, L, per_buffer, params)
    # TODO(synk): unaligned few-channel shapes fall back to the 2-D path (only
    # C of the packed sublanes per vreg are used there).
    return _generic_call(x, N, per_buffer, params)


def _ref(x, n):
    C, T = x.shape
    if n <= T:
        return x[:, :n]
    return jnp.concatenate([x, jnp.zeros((C, n - T), x.dtype)], axis=1)


if __name__ == "__main__":
    key = jax.random.PRNGKey(0)

    # Small shapes consistent with the module's usage: (channels, audio frames).
    C, T = 4, 16
    x = jax.random.normal(key, (C, T), dtype=jnp.float32)

    # Case 1: crop (num_frames <= total frames).
    out = jax.block_until_ready(subsample_audio_frames(x, 8))
    assert out.shape == (C, 8)
    assert jnp.array_equal(out, _ref(x, 8))

    # Case 2: pad (num_frames > total frames).
    out = jax.block_until_ready(subsample_audio_frames(x, 24))
    assert out.shape == (C, 24)
    assert jnp.array_equal(out, _ref(x, 24))

    # 128-aligned few-channel shapes -> sublane-dense reshaped fast path.
    x2 = jax.random.normal(jax.random.PRNGKey(1), (4, 2048), dtype=jnp.float32)
    out = jax.block_until_ready(subsample_audio_frames(x2, 1024))   # dense crop
    assert jnp.array_equal(out, _ref(x2, 1024))
    out = jax.block_until_ready(subsample_audio_frames(x2, 3072))   # dense pad
    assert jnp.array_equal(out, _ref(x2, 3072))

    # Dense path with a partial trailing row block.
    x2b = jax.random.normal(jax.random.PRNGKey(4), (2, 1024), dtype=jnp.float32)
    out = jax.block_until_ready(subsample_audio_frames(x2b, 640))
    assert jnp.array_equal(out, _ref(x2b, 640))

    # Dense pad from a single short channel.
    x2c = jax.random.normal(jax.random.PRNGKey(5), (1, 256), dtype=jnp.float32)
    out = jax.block_until_ready(subsample_audio_frames(x2c, 1024))
    assert jnp.array_equal(out, _ref(x2c, 1024))

    # Unaligned shapes -> generic 2-D path (partial edge blocks, pad straddle).
    x3 = jax.random.normal(jax.random.PRNGKey(2), (12, 300), dtype=jnp.float32)
    out = jax.block_until_ready(subsample_audio_frames(x3, 200))
    assert jnp.array_equal(out, _ref(x3, 200))
    out = jax.block_until_ready(subsample_audio_frames(x3, 400))
    assert jnp.array_equal(out, _ref(x3, 400))

    # Regression: T not a multiple of TN with T > N — the last partial input
    # block deliberately carries stale lanes past T; only columns < N may
    # reach the output.
    x4 = jax.random.normal(jax.random.PRNGKey(3), (4, 210), dtype=jnp.float32)
    out = jax.block_until_ready(subsample_audio_frames(x4, 200))
    assert jnp.array_equal(out, _ref(x4, 200))

    # Short output from a long input: only a 128-column prefix is DMA'd.
    x5 = jax.random.normal(jax.random.PRNGKey(6), (4, 256), dtype=jnp.float32)
    out = jax.block_until_ready(subsample_audio_frames(x5, 64))
    assert jnp.array_equal(out, _ref(x5, 64))

    # bf16: dtype-aware sublane packing (pack=16) still hits the dense path.
    x6 = jax.random.normal(
        jax.random.PRNGKey(7), (4, 256), dtype=jnp.float32).astype(jnp.bfloat16)
    out = jax.block_until_ready(subsample_audio_frames(x6, 128))
    assert jnp.array_equal(out, _ref(x6, 128))

    print("KERNEL_OK")
</pallas_src>

<mosaic_0001>
module attributes {stable_mosaic.version = 11 : i64} {
  func.func @kernel(%arg0: i32, %arg1: i32, %arg2: memref<4x16xf32, #tpu.memory_space<vmem>>, %arg3: memref<4x8xf32, #tpu.memory_space<vmem>>) attributes {dimension_semantics = [#tpu.dimension_semantics<parallel>, #tpu.dimension_semantics<parallel>], iteration_bounds = array<i64: 1, 1>, scalar_prefetch = 0 : i64, scratch_operands = 0 : i64, tpu.core_type = #tpu.core_type<tc>, window_params = [{transform_indices = @transform_0, window_bounds = array<i64: 4, 16>}, {transform_indices = @transform_1, window_bounds = array<i64: 4, 8>}]} {
    %c0 = arith.constant 0 : index
    %c0_0 = arith.constant 0 : index
    %0 = vector.load %arg2[%c0, %c0_0] : memref<4x16xf32, #tpu.memory_space<vmem>>, vector<4x8xf32>
    %c0_1 = arith.constant 0 : index
    %c0_2 = arith.constant 0 : index
    %1 = vector.load %arg3[%c0_1, %c0_2] : memref<4x8xf32, #tpu.memory_space<vmem>>, vector<4x8xf32>
    tpu.vector_store %arg3[%c0_1, %c0_2], %0 {strides = array<i32>} : memref<4x8xf32, #tpu.memory_space<vmem>>, vector<4x8xf32>,
    return
  }
  func.func @transform_0(%arg0: i32, %arg1: i32) -> (i32, i32) {
    %c0_i32 = arith.constant 0 : i32
    %c0_i32_0 = arith.constant 0 : i32
    return %arg0, %c0_i32 : i32, i32
  }
  func.func @transform_1(%arg0: i32, %arg1: i32) -> (i32, i32) {
    %c0_i32 = arith.constant 0 : i32
    return %arg0, %arg1 : i32, i32
  }
}

</mosaic_0001>

<bundles_post_ra>
// kernel: tpu_custom_call.1
= control target key start
LH: loop header
LB: loop body
LE: loop exit
PB: predicated region body
PF: predicated region fallthrough
CT: control target
= control target key end

     0   :  { %6 = vsyncpa [#allocation3], 0  ;;  %s103_s0 = inlined_call_operand.hbm [shape: f32[4,16], index: 0, kind: input, shape index: {}]   ;;  %s104_s1 = inlined_call_operand.hbm [shape: f32[4,8], index: 1, kind: output, shape index: {}]  }
   0x1   :  { %7 = vsyncpa [#allocation4], 0  ;;  %s85_s6 = smov [#allocation2]  }
   0x2   :  { %s14_s7 = sshll.u32 %s85_s6, 4  ;;  %s15_s7 = int_to_ptr.vmem [resolvable:$true] %s14_s7 }
   0x3   :  { %s49_s8 = scalar_lea.vmem %s15_s7, 64  ;;  %p54_p1 = scmp.lt.s32.totalorder %s15_s7, %s15_s7 }
   0x4   :  { %p50_p0 = scmp.ne.s32.totalorder %s15_s7, %s49_s8  ;;  %p55_p2 = scmp.lt.s32.totalorder %s49_s8, %s49_s8 }
   0x6   :  { %p56_p3 = por %p55_p2, %p54_p1 }
   0x8   :  { %p57_p4 = pnand %p56_p3, %p50_p0 }
   0xa   :  { %60 = shalt.err (!%p57_p4)
}
   0xb   :  { %17 = dma.hbm_to_vmem [thread:$0]  %s103_s0, 64, %s15_s7, [#allocation3]  }
   0xc   :  { %81 = dma.done.wait [#allocation3], 64  }
   0xd   :  { %82 = vsyncadd [#allocation3], 4294967232  ;;  %s86_s11 = smov [#allocation5]   ;;  %vm22_vm0 = vcmask 60416   ;;  %v21_v0 = vld [vmem:[#allocation2] sm:$0xf] }
   0xe   :  { %s30_s12 = sshll.u32 %s86_s11, 4  ;;  %23 = vst.msk [vmem:[#allocation5] sm:$0xf] %vm22_vm0, %v21_v0  ;;  %s31_s12 = int_to_ptr.vmem [resolvable:$true] %s30_s12 }
   0xf   :  { %s61_s13 = scalar_lea.vmem %s31_s12, 64  ;;  %p66_p6 = scmp.lt.s32.totalorder %s31_s12, %s31_s12 }
  0x10   :  { %p62_p5 = scmp.ne.s32.totalorder %s31_s12, %s61_s13  ;;  %p67_p7 = scmp.lt.s32.totalorder %s61_s13, %s61_s13 }
  0x12   :  { %p68_p8 = por %p67_p7, %p66_p6 }
  0x14   :  { %p69_p9 = pnand %p68_p8, %p62_p5 }
  0x16   :  { %72 = shalt.err (!%p69_p9)
}
  0x17   :  { %33 = dma.vmem_to_hbm [thread:$0]  %s31_s12, 64, %s104_s1, [#allocation4]  }
  0x18   :  { %83 = dma.done.wait [#allocation4], 64  }
  0x19   :  { %84 = vsyncadd [#allocation4], 4294967232 }
  0x1a   :  { %37 = vsyncpa [#allocation3], 1 }
  0x1b   :  { %38 = vsyncpa [#allocation4], 1 }

</bundles_post_ra>
